<compile_context>
chip_gen: v7x
topology: tpu7x:2x2x1
jax: 0.10.0
libtpu: 0.0.40
codegen_flags: <defaults>
</compile_context>

<pallas_src>
import jax
import jax.numpy as jnp
from jax.experimental import pallas as pl
from jax.experimental.pallas import tpu as pltpu


def _span_classifier_kernel(x_ref, w_ref, o_ref):
    # x_ref: (TM, H), w_ref: (H, C_out) (resident), o_ref: (TM, C_out)
    o_ref[...] = jnp.dot(
        x_ref[...], w_ref[...], preferred_element_type=jnp.float32
    ).astype(o_ref.dtype)


def _round_up(x, m):
    return ((x + m - 1) // m) * m


def _vmem_capacity_bytes():
    """Physical VMEM per TensorCore; conservative 64 MiB fallback (v7x-sized)."""
    try:
        info = pltpu.get_tpu_info()
        cap = getattr(info, "vmem_capacity_bytes", None)
        if cap:
            return int(cap)
    except Exception:
        pass
    return 64 << 20


def _choose_tiling(m, h, c_out, bytes_per_el, sublane, tile_budget_bytes):
    """Pick (TM, M_pad).

    Prefers a TM that divides M exactly (no wrapper-side pad/slice copy, which
    would be a full-tensor HBM round trip) and gives >= 2 grid steps so both
    v7x TensorCores get work, while keeping the double-buffered input+output
    tiles within the per-generation VMEM budget.
    """
    # Double-buffered input tile + double-buffered output tile, per row.
    per_row = 2 * (h + c_out) * bytes_per_el
    tm_cap = max(sublane, (tile_budget_bytes // max(per_row, 1)) // sublane * sublane)
    # Give the megacore at least two grid steps when there are enough rows.
    if m > sublane:
        tm_cap = min(tm_cap, _round_up(-(-m // 2), sublane))
    tm_cap = min(tm_cap, _round_up(max(m, 1), sublane))

    # Preferred path: largest sublane-multiple divisor of M that fits the cap.
    if m % sublane == 0:
        q = m // sublane
        best = 0
        d = 1
        while d * d <= q:
            if q % d == 0:
                for t in (d * sublane, (q // d) * sublane):
                    if t <= tm_cap and t > best:
                        best = t
            d += 1
        # Accept unless the divisor structure forces pathologically small tiles.
        if best >= max(sublane, tm_cap // 8):
            return int(best), m

    # Fallback (ragged / awkward M): pad rows up to a multiple of the tile.
    tm = int(tm_cap)
    return tm, _round_up(m, tm)


@jax.jit
def span_classifier(features, weight):
    """Pallas implementation of SpanClassifier.forward.

    Args:
      features: (batch, seq, hidden) float array.
      weight:   (n_classes, hidden) array (PyTorch nn.Linear layout, no bias).

    Returns:
      (batch, seq, n_classes) array, same dtype as features.
    """
    B, S, H = features.shape
    C, H2 = weight.shape
    assert H == H2, "hidden_dim mismatch between features and weight"

    M = B * S
    dtype = features.dtype
    bytes_per_el = jnp.dtype(dtype).itemsize
    # Dtype-aware sublane granule: 8 (f32) / 16 (bf16) / 32 (int8).
    sublane = max(8, 32 // bytes_per_el)

    # Only pad the class axis to 128 when the pad is cheap (<= ~25% extra
    # output traffic); otherwise keep it unpadded (full-dim block is legal).
    c128 = _round_up(C, 128)
    pad_classes = (c128 == C) or (c128 * 4 <= C * 5)
    C_out = c128 if pad_classes else C

    # Per-generation VMEM budget: ~48 MiB tiles on 64 MiB parts (v7x),
    # ~96 MiB on 128 MiB parts (v5e/v6e).
    cap = _vmem_capacity_bytes()
    base_budget = (48 << 20) if cap <= (64 << 20) else (96 << 20)
    weight_bytes = 2 * H * C_out * bytes_per_el   # double-buffered resident weight
    headroom = 4 << 20
    tile_budget = max(base_budget - weight_bytes - headroom, 1 << 20)

    TM, M_pad = _choose_tiling(M, H, C_out, bytes_per_el, sublane, tile_budget)
    num_tiles = M_pad // TM

    # (M_pad, H) features; the reshape is free, padding only on the rare
    # fallback path where no good divisor tile exists.
    x2d = features.reshape(M, H)
    if M_pad != M:
        x2d = jnp.pad(x2d, ((0, M_pad - M), (0, 0)))

    # (H, C_out) weight; tiny, built once per call.
    if pad_classes and C_out != C:
        w_t = jnp.zeros((H, C_out), dtype=dtype).at[:, :C].set(weight.T.astype(dtype))
    else:
        w_t = weight.T.astype(dtype)

    # VMEM limit consistent with the chosen tiling, capped below physical VMEM.
    vmem_need = 2 * TM * (H + C_out) * bytes_per_el + weight_bytes + headroom
    vmem_limit = int(min(max(vmem_need, 16 << 20), int(cap * 0.85)))

    cost = pl.CostEstimate(
        flops=2 * M_pad * H * C_out,
        bytes_accessed=(M_pad * H + H * C_out + M_pad * C_out) * bytes_per_el,
        transcendentals=0,
    )

    out2d = pl.pallas_call(
        _span_classifier_kernel,
        out_shape=jax.ShapeDtypeStruct((M_pad, C_out), dtype),
        grid_spec=pltpu.PrefetchScalarGridSpec(
            num_scalar_prefetch=0,
            grid=(num_tiles,),
            in_specs=[
                # features: stream M tiles (auto double-buffered).
                pl.BlockSpec((TM, H), lambda i: (i, 0)),
                # weight: constant block index -> stays resident in VMEM.
                pl.BlockSpec((H, C_out), lambda i: (0, 0)),
            ],
            out_specs=pl.BlockSpec((TM, C_out), lambda i: (i, 0)),
        ),
        compiler_params=pltpu.CompilerParams(
            # "parallel" is the documented megacore sharding mechanism; with
            # num_tiles >= 2 (ensured above when M allows) both v7x TCs stream.
            dimension_semantics=("parallel",),
            vmem_limit_bytes=vmem_limit,
        ),
        cost_estimate=cost,
    )(x2d, w_t)

    # Common case: no padding anywhere -> this is just a free reshape.
    if M_pad != M or C_out != C:
        out2d = out2d[:M, :C]
    return out2d.reshape(B, S, C)


def xavier_uniform(key, n_classes, hidden_dim, dtype=jnp.float32):
    # Matches torch.nn.init.xavier_uniform_ for a (n_classes, hidden_dim) weight:
    # fan_in = hidden_dim, fan_out = n_classes, bound = sqrt(6 / (fan_in + fan_out)).
    bound = (6.0 / (hidden_dim + n_classes)) ** 0.5
    return jax.random.uniform(
        key, (n_classes, hidden_dim), dtype=dtype, minval=-bound, maxval=bound
    )


if __name__ == "__main__":
    key = jax.random.PRNGKey(0)
    k_feat, k_w = jax.random.split(key)

    batch, seq, hidden_dim, n_classes = 2, 8, 32, 8

    features = jax.random.normal(
        k_feat, (batch, seq, hidden_dim), dtype=jnp.float32
    )
    weight = xavier_uniform(k_w, n_classes, hidden_dim)

    out = span_classifier(features, weight)
    out = jax.block_until_ready(out)

    # Reference check in plain JAX (same semantics as torch: features @ W.T).
    ref = features @ weight.T
    assert out.shape == (batch, seq, n_classes)
    assert jnp.allclose(out, ref, atol=1e-5, rtol=1e-5), "mismatch vs reference"

    print("KERNEL_OK")
</pallas_src>

<mosaic_0001>
module attributes {stable_mosaic.version = 11 : i64} {
  func.func @_span_classifier_kernel(%arg0: i32, %arg1: memref<8x32xf32, #tpu.memory_space<vmem>>, %arg2: memref<32x8xf32, #tpu.memory_space<vmem>>, %arg3: memref<8x8xf32, #tpu.memory_space<vmem>>) attributes {dimension_semantics = [#tpu.dimension_semantics<parallel>], iteration_bounds = array<i64: 2>, scalar_prefetch = 0 : i64, scratch_operands = 0 : i64, tpu.core_type = #tpu.core_type<tc>, window_params = [{transform_indices = @transform_0, window_bounds = array<i64: 8, 32>}, {pipeline_mode = #tpu.pipeline_mode<synchronous>, transform_indices = @transform_1, window_bounds = array<i64: 32, 8>}, {transform_indices = @transform_2, window_bounds = array<i64: 8, 8>}]} {
    %c0 = arith.constant 0 : index
    %c0_0 = arith.constant 0 : index
    %0 = vector.load %arg1[%c0, %c0_0] : memref<8x32xf32, #tpu.memory_space<vmem>>, vector<8x32xf32>
    %c0_1 = arith.constant 0 : index
    %c0_2 = arith.constant 0 : index
    %1 = vector.load %arg2[%c0_1, %c0_2] : memref<32x8xf32, #tpu.memory_space<vmem>>, vector<32x8xf32>
    %cst = arith.constant dense<0.000000e+00> : vector<8x8xf32>
    %2 = tpu.matmul %0, %1, %cst {dimension_numbers = #tpu.dot_dimension_numbers<[1], [0], [0], [1], [0, 0, 1, 1], [], []>} : vector<8x32xf32>, vector<32x8xf32>, vector<8x8xf32> -> vector<8x8xf32>
    %c0_3 = arith.constant 0 : index
    %c0_4 = arith.constant 0 : index
    %3 = vector.load %arg3[%c0_3, %c0_4] : memref<8x8xf32, #tpu.memory_space<vmem>>, vector<8x8xf32>
    tpu.vector_store %arg3[%c0_3, %c0_4], %2 {strides = array<i32>} : memref<8x8xf32, #tpu.memory_space<vmem>>, vector<8x8xf32>,
    return
  }
  func.func @transform_0(%arg0: i32) -> (i32, i32) {
    %c0_i32 = arith.constant 0 : i32
    %c0_i32_0 = arith.constant 0 : i32
    return %arg0, %c0_i32 : i32, i32
  }
  func.func @transform_1(%arg0: i32) -> (i32, i32) {
    %c0_i32 = arith.constant 0 : i32
    %c0_i32_0 = arith.constant 0 : i32
    %c0_i32_1 = arith.constant 0 : i32
    return %c0_i32, %c0_i32_0 : i32, i32
  }
  func.func @transform_2(%arg0: i32) -> (i32, i32) {
    %c0_i32 = arith.constant 0 : i32
    %c0_i32_0 = arith.constant 0 : i32
    return %arg0, %c0_i32 : i32, i32
  }
}

</mosaic_0001>

<bundles_post_ra>
// kernel: span_classifier.1
= control target key start
LH: loop header
LB: loop body
LE: loop exit
PB: predicated region body
PF: predicated region fallthrough
CT: control target
= control target key end

     0   :  { %7 = vsyncpa [#allocation3], 0  ;;  %s563_s0 = inlined_call_operand.vmem [shape: f32[16,32], index: 0, kind: input, shape index: {}]   ;;  %s564_s1 = inlined_call_operand.vmem [shape: f32[32,8], index: 1, kind: input, shape index: {}]   ;;  %s565_s2 = inlined_call_operand.hbm [shape: f32[16,8], index: 2, kind: output, shape index: {}]  }
   0x1   :  { %9 = vsyncpa [#allocation3 + $0x1], 0  ;;  %s451_s9 = smov 0   ;;  %s453_s10 = smov 0  }
   0x2   :  { %s455_s11 = smov 0   ;;  %s457_s12 = smov 0  }
   0x3 LB: > { %s472_s13 = sadd.s32 4294967295, %s430_s12   ;;  %s293_s14 = sadd.s32 4294967294, %s430_s12   ;;  %s430_s12 = sphi %s457_s12, %s571_s12   ;;  %s426_s11 = sphi %s455_s11, %s570_s11   ;;  %s422_s10 = sphi %s453_s10, %s569_s10   ;;  %s418_s9 = sphi %s451_s9, %s568_s9  }
   0x4   : > { %s476_s15 = sadd.s32 1, %s430_s12   ;;  %s69_s16 = sadd.s32 1, %s426_s11 }
   0x5   : > { %s66_s17 = ssub.s32 %s430_s12, %s476_s15  ;;  %p79_p0 = scmp.ne.s32.totalorder %s426_s11, %s422_s10 }
   0x6   : > { %p67_p1 = scmp.eq.s32.totalorder %s66_s17, 0  ;;  %p80_p2 = scmp.eq.s32.totalorder %s472_s13, 1 }
   0x7   : > { %p85_p3 = scmp.ne.s32.totalorder %s422_s10, %s418_s9  ;;  %p86_p4 = scmp.eq.s32.totalorder %s293_s14, 1 }
   0x8   : > { %s487_s18 = scalar_select %p67_p1, %s426_s11, %s69_s16  }
   0x9   : > { %p489_p5 = por %p80_p2, %p79_p0  ;;  %p493_p6 = por %p86_p4, %p85_p3 }
   0xa   : > { %p296_p7 = scmp.ge.s32.totalorder %s430_s12, 1  ;;  %p114_p8 = scmp.lt.s32.totalorder %s430_s12, 3 }
   0xc   : > { %p115_p9 = pnand %p296_p7, %p114_p8 }
   0xd   : > { %v140_v0 = vld [vmem:[%s564_s1] sm:$0xff] (!%p115_p9)  ;;  %v141_v1 = vld [vmem:[%s564_s1 + $0x8] sm:$0xff] (!%p115_p9)  ;;  %v142_v2 = vld [vmem:[%s564_s1 + $0x10] sm:$0xff] (!%p115_p9)  ;;  %v432_v3 = vmov (!%p115_p9), 0.0|0.0   ;;  %vm433_vm0 = vmmov (!%p115_p9), 0   ;;  %v434_v6 = vmov (!%p115_p9), 0.0  }
   0xe   : > { %118 = sbr.rel (%p115_p9) target bundleno = 252 (0xfc), region = 28  ;;  %320 = vmatprep.subr.bf16.mxu0 (!%p115_p9), %v432_v3  ;;  %v321_v4 = vpack.c.bf16 (!%p115_p9), %v141_v1, %v140_v0  ;;  %v143_v5 = vld [vmem:[%s564_s1 + $0x18] sm:$0xff] (!%p115_p9)  ;;  %317 = vmatprep.mubr.msk.f32.mxu0 (!%p115_p9), %vm433_vm0, %v434_v6  ;;  %p135_p10 = scmp.lt.s32.totalorder (!%p115_p9), %s472_s13, 1  ;;  %vm144_vm1 = vcmask (!%p115_p9), 261120   ;;  %vm218_vm2 = vcmask (!%p115_p9), 64512  }
   0xf   : > { %v324_v7 = vpack.c.bf16 (!%p115_p9), %v143_v5, %v142_v2  ;;  %s132_s6 = sand.u32 (!%p115_p9), 1, %s422_s10   ;;  %s301_s8 = sshll.u32 (!%p115_p9), %s472_s13, 7 }
  0x10   : > { %322 = vmatpush3.bf16.msra.mxu0 (!%p115_p9), %v321_v4  ;;  %s297_s7 = sshll.u32 (!%p115_p9), %s132_s6, 3  ;;  %s521_s22 = scalar_lea.hbm (!%p115_p9), %s565_s2, %s301_s8 }
  0x11   : > { %323 = vmatprep.subr.bf16.mxu0 (!%p115_p9), %v432_v3  ;;  %s134_s14 = scalar_lea.vmem (!%p115_p9), [#allocation2], %s297_s7  ;;  %s221_s23 = scalar_lea.sflag (!%p115_p9), [#allocation3], %s132_s6 }
  0x12   : > { %s234_s16 = sshll.u32 (!%p115_p9), %s134_s14, 4  ;;  %s523_s16 = int_to_ptr.vmem [resolvable:$true] %s234_s16 }
  0x13   : > { %s368_s24 = scalar_lea.vmem (!%p115_p9), %s523_s16, 128 }
  0x14   : > { %325 = vmatpush3.bf16.msra.mxu0 (!%p115_p9), %v324_v7  ;;  %p369_p11 = scmp.ne.s32.totalorder (!%p115_p9), %s523_s16, %s368_s24 }
  0x15   : > { %s136_s29 = scalar_select %p135_p10, %s472_s13, 1 }
  0x16   : > { %p370_p12 = pnand %p369_p11, %p489_p5  ;;  %s435_s13 = smov [#allocation2]  }
  0x17   : > { %s298_s30 = sshll.u32 %s136_s29, 3  ;;  %s372_s25 = sshll.u32 %s435_s13, 4  ;;  %s373_s25 = int_to_ptr.vmem [resolvable:$false] %s372_s25 }
  0x18   : > { %s138_s5 = scalar_lea.vmem %s563_s0, %s298_s30  ;;  %p371_p13 = pneg %p370_p12 }
  0x19   : > { %v139_v8 = vld [vmem:[%s138_s5] sm:$0xff]  ;;  %s374_s26 = scalar_lea.vmem %s373_s25, 256  ;;  %p375_p0 = scmp.lt.s32.totalorder %s523_s16, %s373_s25 }
  0x1a   : > { %318 = vmatmul.mubr.msk.f32.vlgmr.msra.gmra.mrb[0].mxu0 %vm144_vm1, %v139_v8  ;;  %p376_p1 = scmp.lt.s32.totalorder %s374_s26, %s368_s24 }
  0x1c   : > { %p377_p2 = por %p376_p1, %p375_p0 }
  0x1e   : > { %p378_p3 = pnand %p377_p2, %p371_p13 }
  0xed   : > { %v214_v9 = vpop.f32.mrb[0].mxu0 }
  0xee   : > { %219 = vst.msk [vmem:[%s134_s14] sm:$0xff] %vm218_vm2, %v214_v9  ;;  %v319_v10 = vpop.f32.mrb[1].mxu0 }
  0xef   : > { %381 = shalt.err (!%p378_p3)
}
  0xf0   : > { %s382_s27 = scalar_lea.hbm %s521_s22, 128  ;;  %s386_s30 = scalar_lea.hbm %s565_s2, 256 }
  0xf1   : > { %p383_p4 = scmp.ne.s32.totalorder %s521_s22, %s382_s27  ;;  %p387_p9 = scmp.lt.u32.totalorder %s521_s22, %s565_s2 }
  0xf2   : > { %p388_p10 = scmp.lt.u32.totalorder %s386_s30, %s382_s27  ;;  %p390_p12 = scmp.lt.u32.totalorder %s382_s27, %s521_s22 }
  0xf3   : > { %p384_p7 = pnand %p383_p4, %p489_p5 }
  0xf4   : > { %p389_p11 = por %p388_p10, %p387_p9 }
  0xf5   : > { %p385_p8 = pneg %p384_p7 }
  0xf6   : > { %p391_p13 = por %p390_p12, %p389_p11 }
  0xf8   : > { %p392_p0 = pnand %p391_p13, %p385_p8 }
  0xfa   : > { %395 = shalt.err (!%p392_p0)
}
  0xfb   : > { %326 = dma.vmem_to_hbm [thread:$0]  (%p489_p5), %s523_s16, 128, %s521_s22, %s221_s23  }
  0xfc PF: > { %p332_p1 = scmp.ge.s32.totalorder %s430_s12, 2  ;;  %s246_s5 = sand.u32 1, %s418_s9  }
  0xfd   : > { %s247_s6 = scalar_lea.sflag [#allocation3], %s246_s5 }
  0xfe   : > { %p329_p2 = pnand %p332_p1, %p493_p6 }
 0x100   : > { %413 = dma.done.wait (!%p329_p2), %s247_s6, 128  }
 0x101   : > { %415 = vsyncadd (!%p329_p2), %s247_s6, 4294967168  ;;  %p12_p3 = scmp.ge.s32.totalorder %s476_s15, 4   ;;  %s568_s9 = smov %s422_s10 }
 0x102   : > { %s569_s10 = smov %s426_s11  ;;  %s570_s11 = smov %s487_s18 }
 0x103   : > { %s571_s12 = smov %s476_s15  ;;  %14 = sbr.rel (!%p12_p3) target bundleno = 3 (0x3), region = 63 }
 0x10a   :  { %252 = vsyncpa [#allocation3], 1 }
 0x10b   :  { %254 = vsyncpa [#allocation3 + $0x1], 1 }

</bundles_post_ra>
